<compile_context>
chip_gen: v5e
topology: v5e:2x2
jax: 0.10.0
libtpu: 0.0.40
codegen_flags: <defaults>
</compile_context>

<pallas_src>
import functools

import jax
import jax.numpy as jnp
from jax.experimental import pallas as pl
from jax.experimental.pallas import tpu as pltpu


# ------------------------------ Pallas kernel ------------------------------

def _denoise_kernel(x_ref, w_ref, b_ref, m_ref, o_ref, *, H, W, NB):
    """Fused 3x3 avg-pool + 1x1 conv + bias + residual, (C, H*W) layout.

    x_ref: (NB, C, H*W)  input block (NCHW with spatial flattened; lane-dense)
    w_ref: (C, C)        1x1 conv weight, (Cout, Cin), pre-scaled by 1/9
    b_ref: (C, 1)        conv bias
    m_ref: (2, H*W)      f32 masks: [0] left-tap valid (w>0), [1] right-tap valid (w<W-1)
    o_ref: (NB, C, H*W)  output block
    """
    HW = H * W
    C = w_ref.shape[0]

    # Hoisted invariants (loaded / materialized once per grid step).
    w = w_ref[...]                      # (C, C)
    b = b_ref[...]                      # (C, 1) -> broadcasts over HW
    m = m_ref[...]                      # (2, HW)
    mask_l = m[0:1, :]                  # (1, HW)
    mask_r = m[1:2, :]
    zrow = jnp.zeros((C, W), jnp.float32)
    zcol = jnp.zeros((C, 1), jnp.float32)

    for n in range(NB):                 # static, small batch block
        x = x_ref[n].astype(jnp.float32)                       # (C, HW)

        # ---- separable 3x3 sum-pool with zero 'same' padding -------------
        # Vertical taps (rows h-1 / h / h+1): lane shifts by +-W, zero-filled
        # at the top/bottom edge (this IS the zero padding, done in-kernel).
        up = jnp.concatenate([zrow, x[:, :HW - W]], axis=1)    # x at row h-1
        dn = jnp.concatenate([x[:, W:], zrow], axis=1)         # x at row h+1
        rowsum = x + up + dn                                   # acc seeded by centre tap

        # Horizontal taps (cols w-1 / w / w+1): lane shifts by +-1; the shift
        # wraps across row boundaries, so mask out w==0 / w==W-1 positions.
        lf = jnp.concatenate([zcol, rowsum[:, :HW - 1]], axis=1) * mask_l
        rt = jnp.concatenate([rowsum[:, 1:], zcol], axis=1) * mask_r
        pooled = rowsum + lf + rt                               # 9-tap sum (no /9: folded into w)

        # ---- 1x1 conv on MXU (+bias) + residual ---------------------------
        y = jnp.dot(w, pooled, preferred_element_type=jnp.float32) + b   # (C, HW)
        o_ref[n] = (x + y).astype(o_ref.dtype)


# --------------------------------- wrapper ---------------------------------

def denoise_block_forward(x_nchw, w_oihw, b, *, nb=None):
    """Pallas forward for denoise_block.

    x_nchw: (N, C, H, W)   input (PyTorch NCHW convention)
    w_oihw: (C, C, 1, 1)   Conv2d 1x1 weight (OIHW)
    b     : (C,)           Conv2d bias
    returns (N, C, H, W)
    """
    N, C, H, W = x_nchw.shape
    HW = H * W

    # Free layout plumbing only: contiguous reshapes, no transpose, no pad.
    x2 = x_nchw.reshape(N, C, HW)
    w9 = w_oihw.reshape(C, C).astype(jnp.float32) / 9.0   # (Cout, Cin), 1/9 folded (weight only)
    b2 = b.reshape(C, 1).astype(jnp.float32)
    col = jnp.arange(HW, dtype=jnp.int32) % W
    masks = jnp.stack([(col > 0), (col < W - 1)]).astype(jnp.float32)    # (2, HW)

    if nb is None:
        # One grid step per TensorCore on v7x when the batch allows it (N=2 -> grid=(2,));
        # for larger batches this also amortizes per-step overhead.  Keep the
        # double-buffered in+out blocks well under the ~32 MiB scoped-VMEM default.
        nb = N // 2 if (N % 2 == 0 and N >= 2) else 1
        if 4 * nb * C * HW * x_nchw.dtype.itemsize > (8 << 20):
            nb = 1
    assert N % nb == 0, "nb must divide the batch size"

    kern = functools.partial(_denoise_kernel, H=H, W=W, NB=nb)
    out = pl.pallas_call(
        kern,
        out_shape=jax.ShapeDtypeStruct((N, C, HW), x_nchw.dtype),
        grid=(N // nb,),
        in_specs=[
            pl.BlockSpec((nb, C, HW), lambda i: (i, 0, 0)),
            pl.BlockSpec((C, C), lambda i: (0, 0)),      # resident across steps
            pl.BlockSpec((C, 1), lambda i: (0, 0)),
            pl.BlockSpec((2, HW), lambda i: (0, 0)),
        ],
        out_specs=pl.BlockSpec((nb, C, HW), lambda i: (i, 0, 0)),
        compiler_params=pltpu.CompilerParams(
            dimension_semantics=("parallel",)),           # batch axis -> megacore on v7x
    )(x2, w9, b2, masks)
    return out.reshape(N, C, H, W)


# ------------------------------ XLA reference -------------------------------

def denoise_block_ref(x, w_oihw, b):
    """Plain-XLA reference: avgpool3x3(s=1,p=1, count_include_pad) -> conv1x1 -> +x."""
    N, C, H, W = x.shape
    z_r = jnp.zeros((N, C, 1, W), x.dtype)
    z_c = jnp.zeros((N, C, H, 1), x.dtype)
    up = jnp.concatenate([z_r, x[:, :, :H - 1, :]], axis=2)
    dn = jnp.concatenate([x[:, :, 1:, :], z_r], axis=2)
    rowsum = x + up + dn
    lf = jnp.concatenate([z_c, rowsum[:, :, :, :W - 1]], axis=3)
    rt = jnp.concatenate([rowsum[:, :, :, 1:], z_c], axis=3)
    pooled_sum = rowsum + lf + rt                              # 9-tap sum
    w9 = w_oihw.reshape(C, C) / 9.0
    y = jnp.einsum("oc,nchw->nohw", w9, pooled_sum) + b[None, :, None, None]
    return x + y


# ----------------------------------- main -----------------------------------

if __name__ == "__main__":
    key = jax.random.PRNGKey(0)
    k_x, k_w, k_b = jax.random.split(key, 3)

    N, C, H, W = 2, 32, 16, 16
    x = jax.random.normal(k_x, (N, C, H, W), jnp.float32)                # NCHW
    w = jax.random.normal(k_w, (C, C, 1, 1), jnp.float32) / jnp.sqrt(C)  # OIHW
    b = 0.1 * jax.random.normal(k_b, (C,), jnp.float32)

    out = jax.jit(denoise_block_forward)(x, w, b)
    out = jax.block_until_ready(out)

    ref = jax.block_until_ready(denoise_block_ref(x, w, b))
    assert out.shape == (N, C, H, W)
    assert jnp.allclose(out, ref, atol=1e-4, rtol=1e-4), "mismatch vs XLA reference"

    print("KERNEL_OK")
</pallas_src>

<mosaic_0001>
module attributes {stable_mosaic.version = 11 : i64} {
  func.func @_denoise_kernel(%arg0: i32, %arg1: memref<1x32x256xf32, #tpu.memory_space<vmem>>, %arg2: memref<32x32xf32, #tpu.memory_space<vmem>>, %arg3: memref<32x1xf32, #tpu.memory_space<vmem>>, %arg4: memref<2x256xf32, #tpu.memory_space<vmem>>, %arg5: memref<1x32x256xf32, #tpu.memory_space<vmem>>) attributes {dimension_semantics = [#tpu.dimension_semantics<parallel>], iteration_bounds = array<i64: 2>, scalar_prefetch = 0 : i64, scratch_operands = 0 : i64, tpu.core_type = #tpu.core_type<tc>, window_params = [{transform_indices = @transform_0, window_bounds = array<i64: 1, 32, 256>}, {pipeline_mode = #tpu.pipeline_mode<synchronous>, transform_indices = @transform_1, window_bounds = array<i64: 32, 32>}, {pipeline_mode = #tpu.pipeline_mode<synchronous>, transform_indices = @transform_2, window_bounds = array<i64: 32, 1>}, {pipeline_mode = #tpu.pipeline_mode<synchronous>, transform_indices = @transform_3, window_bounds = array<i64: 2, 256>}, {transform_indices = @transform_4, window_bounds = array<i64: 1, 32, 256>}]} {
    %c0 = arith.constant 0 : index
    %c0_0 = arith.constant 0 : index
    %0 = vector.load %arg2[%c0, %c0_0] : memref<32x32xf32, #tpu.memory_space<vmem>>, vector<32x32xf32>
    %c0_1 = arith.constant 0 : index
    %c0_2 = arith.constant 0 : index
    %1 = vector.load %arg3[%c0_1, %c0_2] : memref<32x1xf32, #tpu.memory_space<vmem>>, vector<32x1xf32>
    %c0_3 = arith.constant 0 : index
    %c0_4 = arith.constant 0 : index
    %2 = vector.load %arg4[%c0_3, %c0_4] : memref<2x256xf32, #tpu.memory_space<vmem>>, vector<2x256xf32>
    %3 = vector.extract_strided_slice %2 {offsets = [0, 0], sizes = [1, 256], strides = [1, 1]} : vector<2x256xf32> to vector<1x256xf32>
    %4 = vector.extract_strided_slice %2 {offsets = [1, 0], sizes = [1, 256], strides = [1, 1]} : vector<2x256xf32> to vector<1x256xf32>
    %cst = arith.constant 0.000000e+00 : f32
    %5 = vector.broadcast %cst : f32 to vector<32x16xf32>
    %cst_5 = arith.constant 0.000000e+00 : f32
    %6 = vector.broadcast %cst_5 : f32 to vector<32x1xf32>
    %c0_6 = arith.constant 0 : index
    %c0_7 = arith.constant 0 : index
    %c0_8 = arith.constant 0 : index
    %7 = vector.load %arg1[%c0_6, %c0_7, %c0_8] : memref<1x32x256xf32, #tpu.memory_space<vmem>>, vector<1x32x256xf32>
    %8 = vector.shape_cast %7 : vector<1x32x256xf32> to vector<32x256xf32>
    %9 = vector.extract_strided_slice %8 {offsets = [0, 0], sizes = [32, 240], strides = [1, 1]} : vector<32x256xf32> to vector<32x240xf32>
    %10 = tpu.concatenate %5, %9 in 1 : vector<32x16xf32>, vector<32x240xf32> -> vector<32x256xf32>
    %11 = vector.extract_strided_slice %8 {offsets = [0, 16], sizes = [32, 240], strides = [1, 1]} : vector<32x256xf32> to vector<32x240xf32>
    %12 = tpu.concatenate %11, %5 in 1 : vector<32x240xf32>, vector<32x16xf32> -> vector<32x256xf32>
    %13 = arith.addf %8, %10 : vector<32x256xf32>
    %14 = arith.addf %13, %12 : vector<32x256xf32>
    %15 = vector.extract_strided_slice %14 {offsets = [0, 0], sizes = [32, 255], strides = [1, 1]} : vector<32x256xf32> to vector<32x255xf32>
    %16 = tpu.concatenate %6, %15 in 1 : vector<32x1xf32>, vector<32x255xf32> -> vector<32x256xf32>
    %17 = vector.broadcast %3 : vector<1x256xf32> to vector<32x256xf32>
    %18 = arith.mulf %16, %17 : vector<32x256xf32>
    %19 = vector.extract_strided_slice %14 {offsets = [0, 1], sizes = [32, 255], strides = [1, 1]} : vector<32x256xf32> to vector<32x255xf32>
    %20 = tpu.concatenate %19, %6 in 1 : vector<32x255xf32>, vector<32x1xf32> -> vector<32x256xf32>
    %21 = vector.broadcast %4 : vector<1x256xf32> to vector<32x256xf32>
    %22 = arith.mulf %20, %21 : vector<32x256xf32>
    %23 = arith.addf %14, %18 : vector<32x256xf32>
    %24 = arith.addf %23, %22 : vector<32x256xf32>
    %cst_9 = arith.constant dense<0.000000e+00> : vector<32x256xf32>
    %25 = tpu.matmul %0, %24, %cst_9 {dimension_numbers = #tpu.dot_dimension_numbers<[1], [0], [0], [1], [0, 0, 1, 1], [], []>} : vector<32x32xf32>, vector<32x256xf32>, vector<32x256xf32> -> vector<32x256xf32>
    %26 = vector.broadcast %1 : vector<32x1xf32> to vector<32x256xf32>
    %27 = arith.addf %25, %26 : vector<32x256xf32>
    %28 = arith.addf %8, %27 : vector<32x256xf32>
    %c0_10 = arith.constant 0 : index
    %c0_11 = arith.constant 0 : index
    %c0_12 = arith.constant 0 : index
    %29 = vector.load %arg5[%c0_10, %c0_11, %c0_12] : memref<1x32x256xf32, #tpu.memory_space<vmem>>, vector<1x32x256xf32>
    %30 = vector.shape_cast %29 : vector<1x32x256xf32> to vector<32x256xf32>
    %31 = vector.shape_cast %28 : vector<32x256xf32> to vector<1x32x256xf32>
    tpu.vector_store %arg5[%c0_10, %c0_11, %c0_12], %31 {strides = array<i32>} : memref<1x32x256xf32, #tpu.memory_space<vmem>>, vector<1x32x256xf32>,
    return
  }
  func.func @transform_0(%arg0: i32) -> (i32, i32, i32) {
    %c0_i32 = arith.constant 0 : i32
    %c0_i32_0 = arith.constant 0 : i32
    %c0_i32_1 = arith.constant 0 : i32
    return %arg0, %c0_i32, %c0_i32_0 : i32, i32, i32
  }
  func.func @transform_1(%arg0: i32) -> (i32, i32) {
    %c0_i32 = arith.constant 0 : i32
    %c0_i32_0 = arith.constant 0 : i32
    %c0_i32_1 = arith.constant 0 : i32
    return %c0_i32, %c0_i32_0 : i32, i32
  }
  func.func @transform_2(%arg0: i32) -> (i32, i32) {
    %c0_i32 = arith.constant 0 : i32
    %c0_i32_0 = arith.constant 0 : i32
    %c0_i32_1 = arith.constant 0 : i32
    return %c0_i32, %c0_i32_0 : i32, i32
  }
  func.func @transform_3(%arg0: i32) -> (i32, i32) {
    %c0_i32 = arith.constant 0 : i32
    %c0_i32_0 = arith.constant 0 : i32
    %c0_i32_1 = arith.constant 0 : i32
    return %c0_i32, %c0_i32_0 : i32, i32
  }
  func.func @transform_4(%arg0: i32) -> (i32, i32, i32) {
    %c0_i32 = arith.constant 0 : i32
    %c0_i32_0 = arith.constant 0 : i32
    %c0_i32_1 = arith.constant 0 : i32
    return %arg0, %c0_i32, %c0_i32_0 : i32, i32, i32
  }
}

</mosaic_0001>

<bundles_post_ra>
// kernel: denoise_block_forward.1
= control target key start
LH: loop header
LB: loop body
LE: loop exit
PB: predicated region body
PF: predicated region fallthrough
CT: control target
= control target key end

     0   :  { %s669_s15 = smov 0   ;;  %s894_s0 = inlined_call_operand.vmem [shape: f32[2,32,256], index: 0, kind: input, shape index: {}]   ;;  %s895_s1 = inlined_call_operand.vmem [shape: f32[32,32], index: 1, kind: input, shape index: {}]   ;;  %s896_s2 = inlined_call_operand.vmem [shape: f32[32,1], index: 2, kind: input, shape index: {}]   ;;  %s897_s3 = inlined_call_operand.vmem [shape: f32[2,256], index: 3, kind: input, shape index: {}]   ;;  %s898_s4 = inlined_call_operand.vmem [shape: f32[2,32,256], index: 4, kind: output, shape index: {}]  }
   0x1 LB: > { %s586_s16 = sadd.s32 4294967295, %s637_s15   ;;  %p590_p0 = scmp.ge.s32.totalorder %s637_s15, 1  ;;  %s637_s15 = sphi %s669_s15, %s14_s15  }
   0x2   : > { %p162_p1 = scmp.lt.s32.totalorder %s637_s15, 3 }
   0x4   : > { %p163_p2 = pnand %p590_p0, %p162_p1 }
   0x5   : > { %p188_p3 = scmp.lt.s32.totalorder (!%p163_p2), %s586_s16, 1  ;;  %s639_s21 = smov (!%p163_p2), 16  }
   0x6   : > { %166 = sbr.rel (%p163_p2) target bundleno = 458 (0x1ca), region = 36  ;;  %s640_s22 = smov (!%p163_p2), 112  }
   0x7   : > { %s641_s23 = smov (!%p163_p2), 1   ;;  %s642_s24 = smov (!%p163_p2), 127  }
   0xb   : > { %s900_s16 = smov (!%p188_p3, %s586_s16), 1  ;;  %vm239_vm0 = vcmask 130048   ;;  %vm272_vm1 = vcmask 916480   ;;  %v206_v59 = vld [vmem:[%s897_s3] sm:$0xf]  ;;  %vm329_vm2 = vcmask 7168  }
   0xc   : > { %s605_s17 = sshll.u32 %s900_s16, 6  ;;  %v347_v61 = vperm.slane %v206_v59, 0  ;;  %v348_v62 = vperm.slane %v206_v59, 2  ;;  %vm377_vm3 = vcmask 1039360   ;;  %vm444_vm4 = vcmask 261120  }
   0xd   : > { %s192_s20 = scalar_lea.vmem %s894_s0, %s605_s17 }
   0xe   : > { %v685_v0 = vld [vmem:[%s192_s20 + $0x30] sm:$0xff]  ;;  %v687_v1 = vld [vmem:[%s192_s20 + $0x20] sm:$0xff]  ;;  %v692_v2 = vld [vmem:[%s192_s20 + $0x38] sm:$0xff] }
   0xf   : > { %235 = vrot.lane.b32.xlu0 %v685_v0, %s639_s21  ;;  %231 = vrot.lane.b32.xlu1 %v687_v1, %s639_s21  ;;  %v694_v3 = vld [vmem:[%s192_s20 + $0x28] sm:$0xff]  ;;  %v699_v4 = vld [vmem:[%s192_s20 + $0x18] sm:$0xff] }
  0x10   : > { %268 = vrot.lane.b32.xlu2 %v685_v0, %s640_s22  ;;  %v701_v5 = vld [vmem:[%s192_s20 + $0x10] sm:$0xff]  ;;  %v706_v6 = vld [vmem:[%s192_s20] sm:$0xff]  ;;  %v710_v7 = vld [vmem:[%s192_s20 + $0x8] sm:$0xff] }
  0x17   : > { %237 = vrot.lane.b32.xlu0 %v692_v2, %s639_s21  ;;  %233 = vrot.lane.b32.xlu1 %v694_v3, %s639_s21 }
  0x18   : > { %270 = vrot.lane.b32.xlu2 %v692_v2, %s640_s22 }
  0x1f   : > { %229 = vrot.lane.b32.xlu1 %v699_v4, %s639_s21  ;;  %227 = vrot.lane.b32.xlu0 %v701_v5, %s639_s21 }
  0x20   : > { %264 = vrot.lane.b32.xlu2 %v687_v1, %s640_s22 }
  0x27   : > { %266 = vrot.lane.b32.xlu0 %v694_v3, %s640_s22  ;;  %223 = vrot.lane.b32.xlu1 %v706_v6, %s639_s21 }
  0x28   : > { %225 = vrot.lane.b32.xlu2 %v710_v7, %s639_s21 }
  0x2f   : > { %260 = vrot.lane.b32.xlu0 %v701_v5, %s640_s22  ;;  %262 = vrot.lane.b32.xlu1 %v699_v4, %s640_s22 }
  0x30   : > { %256 = vrot.lane.b32.xlu2 %v706_v6, %s640_s22 }
  0x37   : > { %258 = vrot.lane.b32.xlu0 %v710_v7, %s640_s22  ;;  %s873_s22 = scalar_lea.vmem %s898_s4, %s605_s17 }
  0x6a   : > { %v269_v8 = vpop.permute.xlu2 %268 }
  0x72   : > { %v271_v9 = vpop.permute.xlu2 %270 }
  0x73   : > { %v276_v13 = vsel %vm272_vm1, %v269_v8, %v271_v9  ;;  %v288_v18 = vsel %vm272_vm1, %v271_v9, 0.0  ;;  %v792_v9 = vperm.slane %v347_v61, 0 }
  0x7a   : > { %v265_v24 = vpop.permute.xlu2 %264 }
  0x81   : > { %v236_v10 = vpop.permute.xlu0 %235  ;;  %v232_v11 = vpop.permute.xlu1 %231 }
  0x82   : > { %v255_v12 = vsel %vm239_vm0, 0.0, %v236_v10  ;;  %v254_v25 = vsel %vm239_vm0, 0.0, %v232_v11  ;;  %v226_v37 = vpop.permute.xlu2 %225 }
  0x83   : > { %v295_v14 = vadd.f32 %v255_v12, %v685_v0  ;;  %v293_v27 = vadd.f32 %v254_v25, %v687_v1 }
  0x85   : > { %v720_v15 = vadd.f32 %v295_v14, %v276_v13  ;;  %v395_v14 = vperm.slane %v206_v59, 3 }
  0x87   : > { %325 = vrot.lane.b32.xlu1 %v720_v15, %s641_s23 }
  0x89   : > { %v238_v16 = vpop.permute.xlu0 %237  ;;  %v234_v17 = vpop.permute.xlu1 %233 }
  0x8a   : > { %v243_v19 = vsel %vm239_vm0, %v236_v10, %v238_v16  ;;  %v242_v26 = vsel %vm239_vm0, %v232_v11, %v234_v17  ;;  %v257_v47 = vpop.permute.xlu2 %256  ;;  %v794_v10 = vperm.slane %v348_v62, 0  ;;  %v394_v11 = vperm.slane %v206_v59, 1 }
  0x8b   : > { %v296_v20 = vadd.f32 %v243_v19, %v692_v2  ;;  %v294_v28 = vadd.f32 %v242_v26, %v694_v3 }
  0x8c   : > { %v802_v19 = vperm.slane %v394_v11, 1  ;;  %v205_v11 = vld [vmem:[%s896_s2 + $0x18] sm:$0xff] }
  0x8d   : > { %v727_v21 = vadd.f32 %v296_v20, %v288_v18  ;;  %v804_v20 = vperm.slane %v395_v14, 1 }
  0x8f   : > { %327 = vrot.lane.b32.xlu2 %v727_v21, %s641_s23 }
  0x91   : > { %v230_v22 = vpop.permute.xlu1 %229  ;;  %v228_v23 = vpop.permute.xlu0 %227 }
  0x92   : > { %v241_v35 = vsel %vm239_vm0, %v228_v23, %v230_v22  ;;  %v253_v36 = vsel %vm239_vm0, 0.0, %v228_v23 }
  0x93   : > { %v291_v38 = vadd.f32 %v253_v36, %v701_v5  ;;  %v292_v39 = vadd.f32 %v241_v35, %v699_v4 }
  0x97   : > { %373 = vrot.lane.b32.xlu2 %v720_v15, %s642_s24 }
  0x99   : > { %v267_v29 = vpop.permute.xlu0 %266  ;;  %v224_v30 = vpop.permute.xlu1 %223 }
  0x9a   : > { %v275_v31 = vsel %vm272_vm1, %v265_v24, %v267_v29  ;;  %v287_v32 = vsel %vm272_vm1, %v267_v29, 0.0  ;;  %v252_v46 = vsel %vm239_vm0, 0.0, %v224_v30  ;;  %v240_v52 = vsel %vm239_vm0, %v224_v30, %v226_v37 }
  0x9b   : > { %v739_v33 = vadd.f32 %v293_v27, %v275_v31  ;;  %v741_v34 = vadd.f32 %v294_v28, %v287_v32  ;;  %v289_v48 = vadd.f32 %v252_v46, %v706_v6  ;;  %v290_v54 = vadd.f32 %v240_v52, %v710_v7  ;;  %v204_v46 = vld [vmem:[%s896_s2 + $0x10] sm:$0xff] }
  0x9d   : > { %321 = vrot.lane.b32.xlu0 %v739_v33, %s641_s23  ;;  %323 = vrot.lane.b32.xlu1 %v741_v34, %s641_s23 }
  0xa1   : > { %v261_v40 = vpop.permute.xlu0 %260  ;;  %v263_v41 = vpop.permute.xlu1 %262 }
  0xa2   : > { %v274_v42 = vsel %vm272_vm1, %v261_v40, %v263_v41  ;;  %v286_v43 = vsel %vm272_vm1, %v263_v41, 0.0 }
  0xa3   : > { %v753_v44 = vadd.f32 %v291_v38, %v274_v42  ;;  %v755_v45 = vadd.f32 %v292_v39, %v286_v43 }
  0xa5   : > { %375 = vrot.lane.b32.xlu0 %v727_v21, %s642_s24  ;;  %319 = vrot.lane.b32.xlu2 %v755_v45, %s641_s23 }
  0xa6   : > { %317 = vrot.lane.b32.xlu1 %v753_v44, %s641_s23 }
  0xa9   : > { %v259_v49 = vpop.permute.xlu0 %258 }
  0xaa   : > { %v273_v50 = vsel %vm272_vm1, %v257_v47, %v259_v49  ;;  %v285_v53 = vsel %vm272_vm1, %v259_v49, 0.0  ;;  %v203_v47 = vld [vmem:[%s896_s2 + $0x8] sm:$0xff] }
  0xab   : > { %v766_v51 = vadd.f32 %v289_v48, %v273_v50  ;;  %v777_v55 = vadd.f32 %v290_v54, %v285_v53  ;;  %v643_v53 = vmov 0  }
  0xac   : > { %630 = vset.pattern.permute.xlu1 %v643_v53  ;;  %629 = vset.pattern.permute.xlu0 %v643_v53 }
  0xad   : > { %369 = vrot.lane.b32.xlu0 %v739_v33, %s642_s24  ;;  %313 = vrot.lane.b32.xlu2 %v766_v51, %s641_s23 }
  0xae   : > { %371 = vrot.lane.b32.xlu1 %v741_v34, %s642_s24  ;;  %628 = vset.pattern.permute.xlu2 %v643_v53 }
  0xb5   : > { %315 = vrot.lane.b32.xlu0 %v777_v55, %s641_s23  ;;  %367 = vrot.lane.b32.xlu2 %v755_v45, %s642_s24 }
  0xb6   : > { %365 = vrot.lane.b32.xlu1 %v753_v44, %s642_s24 }
  0xbd   : > { %361 = vrot.lane.b32.xlu0 %v766_v51, %s642_s24 }
  0xbe   : > { %363 = vrot.lane.b32.xlu1 %v777_v55, %s642_s24 }
  0xc5   : > { %431 = vperm.xlu0 %629, %v203_v47  }
  0xc6   : > { %436 = vperm.xlu1 %630, %v204_v46  }
  0xe9   : > { %v328_v56 = vpop.permute.xlu2 %327 }
  0xf1   : > { %v374_v57 = vpop.permute.xlu2 %373 }
  0xf9   : > { %v326_v58 = vpop.permute.xlu1 %325 }
  0xfa   : > { %v333_v12 = vsel %vm329_vm2, %v326_v58, %v328_v56  ;;  %v345_v13 = vsel %vm329_vm2, 0.0, %v326_v58 }
  0xfb   : > { %v359_v16 = vmul.f32 %v792_v9, %v345_v13  ;;  %v360_v17 = vmul.f32 %v794_v10, %v333_v12 }
  0xfd   : > { %v414_v28 = vadd.f32 %v359_v16, %v720_v15  ;;  %v415_v29 = vadd.f32 %v360_v17, %v727_v21 }
  0xff   : > { %v320_v60 = vpop.permute.xlu2 %319 }
 0x107   : > { %v800_v18 = vpop.permute.xlu2 %313 }
 0x108   : > { %v342_v12 = vsel %vm329_vm2, 0.0, %v800_v18 }
 0x109   : > { %v353_v16 = vmul.f32 %v792_v9, %v342_v12 }
 0x10f   : > { %v322_v63 = vpop.permute.xlu0 %321  ;;  %v324_v8 = vpop.permute.xlu1 %323 }
 0x110   : > { %v344_v30 = vsel %vm329_vm2, 0.0, %v322_v63  ;;  %v332_v31 = vsel %vm329_vm2, %v322_v63, %v324_v8  ;;  %v368_v39 = vpop.permute.xlu2 %367 }
 0x111   : > { %v357_v37 = vmul.f32 %v792_v9, %v344_v30  ;;  %v358_v38 = vmul.f32 %v794_v10, %v332_v31  ;;  %v391_v48 = vsel %vm377_vm3, %v368_v39, 0.0 }
 0x112   : > { %v403_v59 = vmul.f32 %v804_v20, %v391_v48 }
 0x113   : > { %v412_v43 = vadd.f32 %v357_v37, %v739_v33  ;;  %v413_v52 = vadd.f32 %v358_v38, %v741_v34  ;;  %v202_v33 = vld [vmem:[%s896_s2] sm:$0xff] }
 0x114   : > { %426 = vperm.xlu2 %628, %v202_v33  }
 0x117   : > { %v376_v22 = vpop.permute.xlu0 %375 }
 0x118   : > { %v381_v23 = vsel %vm377_vm3, %v374_v57, %v376_v22  ;;  %v393_v24 = vsel %vm377_vm3, %v376_v22, 0.0  ;;  %v318_v25 = vpop.permute.xlu1 %317 }
 0x119   : > { %v406_v26 = vmul.f32 %v802_v19, %v381_v23  ;;  %v407_v27 = vmul.f32 %v804_v20, %v393_v24  ;;  %v331_v36 = vsel %vm329_vm2, %v318_v25, %v320_v60  ;;  %v343_v54 = vsel %vm329_vm2, 0.0, %v318_v25 }
 0x11a   : > { %v356_v15 = vmul.f32 %v794_v10, %v331_v36  ;;  %v355_v34 = vmul.f32 %v792_v9, %v343_v54 }
 0x11b   : > { %v422_v32 = vadd.f32 %v414_v28, %v406_v26  ;;  %v423_v35 = vadd.f32 %v415_v29, %v407_v27  ;;  %v198_v29 = vld [vmem:[%s895_s1] sm:$0xff] }
 0x11c   : > { %v411_v56 = vadd.f32 %v356_v15, %v755_v45  ;;  %v410_v8 = vadd.f32 %v355_v34, %v753_v44  ;;  %441 = vperm.xlu2 %628, %v205_v11  }
 0x11d   : > { %469 = vmatpush.msra.mxu0 %v422_v32  ;;  %607 = vmatpush.msra.mxu2 %v422_v32 }
 0x11e   : > { %498 = vmatpush.msra.mxu1 %v423_v35  ;;  %611 = vmatpush.msra.mxu3 %v423_v35  ;;  %v419_v61 = vadd.f32 %v411_v56, %v403_v59 }
 0x11f   : > { %v370_v21 = vpop.permute.xlu0 %369 }
 0x120   : > { %v372_v40 = vpop.permute.xlu1 %371 }
 0x121   : > { %v380_v41 = vsel %vm377_vm3, %v370_v21, %v372_v40  ;;  %v392_v42 = vsel %vm377_vm3, %v372_v40, 0.0 }
 0x122   : > { %v404_v49 = vmul.f32 %v802_v19, %v380_v41  ;;  %v405_v50 = vmul.f32 %v804_v20, %v392_v42 }
 0x124   : > { %v420_v57 = vadd.f32 %v412_v43, %v404_v49  ;;  %v421_v58 = vadd.f32 %v413_v52, %v405_v50 }
 0x126   : > { %470 = vmatpush.msra.mxu0 %v420_v57  ;;  %608 = vmatpush.msra.mxu2 %v420_v57 }
 0x127   : > { %499 = vmatpush.msra.mxu1 %v421_v58  ;;  %612 = vmatpush.msra.mxu3 %v421_v58  ;;  %v316_v60 = vpop.permute.xlu0 %315 }
 0x128   : > { %v366_v62 = vpop.permute.xlu1 %365  ;;  %v330_v13 = vsel %vm329_vm2, %v800_v18, %v316_v60  ;;  %v408_v18 = vadd.f32 %v353_v16, %v766_v51  ;;  %v201_v51 = vld [vmem:[%s895_s1 + $0x18] sm:$0xff] }
 0x129   : > { %500 = vmatpush.msra.mxu1 %v419_v61  ;;  %613 = vmatpush.msra.mxu3 %v419_v61  ;;  %v379_v45 = vsel %vm377_vm3, %v366_v62, %v368_v39  ;;  %v354_v17 = vmul.f32 %v794_v10, %v330_v13  ;;  %v200_v10 = vld [vmem:[%s895_s1 + $0x10] sm:$0xff] }
 0x12a   : > { %v402_v63 = vmul.f32 %v802_v19, %v379_v45 }
 0x12b   : > { %v409_v27 = vadd.f32 %v354_v17, %v777_v55  ;;  %v199_v55 = vld [vmem:[%s895_s1 + $0x8] sm:$0xff] }
 0x12c   : > { %v418_v14 = vadd.f32 %v410_v8, %v402_v63 }
 0x12e   : > { %471 = vmatpush.msra.mxu0 %v418_v14  ;;  %609 = vmatpush.msra.mxu2 %v418_v14 }
 0x12f   : > { %v362_v22 = vpop.permute.xlu0 %361 }
 0x130   : > { %v364_v44 = vpop.permute.xlu1 %363 }
 0x131   : > { %v378_v23 = vsel %vm377_vm3, %v362_v22, %v364_v44  ;;  %v390_v24 = vsel %vm377_vm3, %v364_v44, 0.0 }
 0x132   : > { %v400_v25 = vmul.f32 %v802_v19, %v378_v23  ;;  %v401_v26 = vmul.f32 %v804_v20, %v390_v24 }
 0x134   : > { %v416_v28 = vadd.f32 %v408_v18, %v400_v25  ;;  %v417_v9 = vadd.f32 %v409_v27, %v401_v26 }
 0x136   : > { %472 = vmatpush.msra.mxu0 %v416_v28  ;;  %610 = vmatpush.msra.mxu2 %v416_v28 }
 0x137   : > { %501 = vmatpush.msra.mxu1 %v417_v9  ;;  %614 = vmatpush.msra.mxu3 %v417_v9  ;;  %v432_v40 = vpop.permute.xlu0 %431 }
 0x138   : > { %597 = vmatmul.msk.f32.vlgmr.msra.gmra.mxu2 %vm444_vm4, %v200_v10  ;;  %601 = vmatmul.msk.f32.vlgmr.msra.gmra.mxu3 %vm444_vm4, %v200_v10  ;;  %v437_v37 = vpop.permute.xlu1 %436 }
 0x139   : > { %595 = vmatmul.msk.f32.vlgmr.msra.gmra.mxu0 %vm444_vm4, %v198_v29  ;;  %599 = vmatmul.msk.f32.vlgmr.msra.gmra.mxu1 %vm444_vm4, %v198_v29 }
 0x140   : > { %598 = vmatmul.msk.f32.gmra.mxu2 %vm444_vm4, %v201_v51  ;;  %602 = vmatmul.msk.f32.gmra.mxu3 %vm444_vm4, %v201_v51 }
 0x141   : > { %596 = vmatmul.msk.f32.gmra.mxu0 %vm444_vm4, %v199_v55  ;;  %600 = vmatmul.msk.f32.gmra.mxu1 %vm444_vm4, %v199_v55 }
 0x16e   : > { %v427_v19 = vpop.permute.xlu2 %426 }
 0x176   : > { %v442_v49 = vpop.permute.xlu2 %441 }
 0x1b6   : > { %v474_v20 = vpop.f32.mrf.mxu0  ;;  %v503_v30 = vpop.f32.mrf.mxu1 }
 0x1b7   : > { %v475_v31 = vadd.f32 %v474_v20, %v427_v19  ;;  %v504_v32 = vadd.f32 %v503_v30, %v427_v19 }
 0x1b9   : > { %v515_v35 = vadd.f32 %v475_v31, %v706_v6  ;;  %v516_v36 = vadd.f32 %v504_v32, %v710_v7 }
 0x1bb   : > { %523 = vst [vmem:[%s873_s22] sm:$0xff] %v515_v35  ;;  %v480_v38 = vpop.f32.mrf.mxu2  ;;  %v509_v39 = vpop.f32.mrf.mxu3 }
 0x1bc   : > { %524 = vst [vmem:[%s873_s22 + $0x8] sm:$0xff] %v516_v36  ;;  %v481_v15 = vadd.f32 %v480_v38, %v437_v37  ;;  %v510_v21 = vadd.f32 %v509_v39, %v437_v37 }
 0x1be   : > { %v519_v41 = vadd.f32 %v481_v15, %v687_v1  ;;  %v520_v42 = vadd.f32 %v510_v21, %v694_v3  ;;  %v477_v43 = vpop.f32.mrf.mxu0  ;;  %v506_v6 = vpop.f32.mrf.mxu1 }
 0x1bf   : > { %v478_v46 = vadd.f32 %v477_v43, %v432_v40  ;;  %v507_v7 = vadd.f32 %v506_v6, %v432_v40 }
 0x1c0   : > { %527 = vst [vmem:[%s873_s22 + $0x20] sm:$0xff] %v519_v41 }
 0x1c1   : > { %528 = vst [vmem:[%s873_s22 + $0x28] sm:$0xff] %v520_v42  ;;  %v517_v47 = vadd.f32 %v478_v46, %v701_v5  ;;  %v518_v48 = vadd.f32 %v507_v7, %v699_v4 }
 0x1c3   : > { %525 = vst [vmem:[%s873_s22 + $0x10] sm:$0xff] %v517_v47  ;;  %v483_v50 = vpop.f32.mrf.mxu2  ;;  %v512_v52 = vpop.f32.mrf.mxu3 }
 0x1c4   : > { %v484_v53 = vadd.f32 %v483_v50, %v442_v49  ;;  %526 = vst [vmem:[%s873_s22 + $0x18] sm:$0xff] %v518_v48  ;;  %v513_v1 = vadd.f32 %v512_v52, %v442_v49 }
 0x1c6   : > { %v521_v3 = vadd.f32 %v484_v53, %v685_v0  ;;  %v522_v33 = vadd.f32 %v513_v1, %v692_v2 }
 0x1c8   : > { %529 = vst [vmem:[%s873_s22 + $0x30] sm:$0xff] %v521_v3 }
 0x1c9   : > { %530 = vst [vmem:[%s873_s22 + $0x38] sm:$0xff] %v522_v33 }
 0x1ca PF: > { %s14_s15 = sadd.s32 1, %s637_s15  }
 0x1cb   : > { %p11_p4 = scmp.ge.s32.totalorder %s14_s15, 4  }
 0x1cd   :  { %13 = sbr.rel (!%p11_p4) target bundleno = 1 (0x1), region = 66 }

</bundles_post_ra>
